<compile_context>
chip_gen: v7x
topology: tpu7x:2x2x1
jax: 0.10.0
libtpu: 0.0.40
codegen_flags: <defaults>
</compile_context>

<pallas_src>
import functools

import jax
import jax.numpy as jnp
import numpy as np
from jax.experimental import pallas as pl
from jax.experimental.pallas import tpu as pltpu


def _round_up(a, b):
    return (a + b - 1) // b * b


def _pick_tile(total, quantum, cap):
    """Largest multiple of `quantum` that divides `total` and is <= cap."""
    best = quantum
    t = quantum
    limit = min(total, cap)
    while t <= limit:
        if total % t == 0:
            best = t
        t += quantum
    return best


# ----------------------------- pass 1: pooled reductions ---------------------
def _pool_reduce_kernel(x_ref, sum_ref, max_ref, *, hw_real, hw_tile, mask_lanes):
    # x_ref: (ROWS_TILE, HW_TILE)  sum_ref / max_ref: (ROWS_TILE, 1) f32
    hw_idx = pl.program_id(1)

    @pl.when(hw_idx == 0)
    def _():
        sum_ref[...] = jnp.zeros_like(sum_ref)
        max_ref[...] = jnp.full_like(max_ref, -jnp.inf)

    x = x_ref[...].astype(jnp.float32)
    if mask_lanes:
        # Lane padding exists: zeros are fine for the sum, but the max needs
        # padded lanes excluded.
        col = jax.lax.broadcasted_iota(jnp.int32, x.shape, 1) + hw_idx * hw_tile
        x_for_max = jnp.where(col < hw_real, x, -jnp.inf)
    else:
        x_for_max = x

    sum_ref[...] += jnp.sum(x, axis=-1, keepdims=True)
    max_ref[...] = jnp.maximum(max_ref[...], jnp.max(x_for_max, axis=-1, keepdims=True))


# ----------------------------- tiny FC + sigmoid -----------------------------
def _fc_mask_kernel(sum_ref, max_ref, w1_ref, b1_ref, w2_ref, b2_ref, m_ref, *, inv_hw):
    # sum_ref/max_ref: (B, C); w1: (C, Ch); b1: (1, Ch); w2: (Ch, C); b2: (1, C)
    avg = sum_ref[...] * inv_hw
    mx = max_ref[...]

    def fcnet(y):
        # Linear -> Tanh -> (Dropout = identity, eval mode) -> Linear -> Tanh
        h = jnp.tanh(jnp.dot(y, w1_ref[...], preferred_element_type=jnp.float32) + b1_ref[...])
        return jnp.tanh(jnp.dot(h, w2_ref[...], preferred_element_type=jnp.float32) + b2_ref[...])

    m_ref[...] = jax.nn.sigmoid(fcnet(avg) + fcnet(mx))


# ----------------------------- pass 2: broadcast multiply --------------------
def _scale_kernel(x_ref, m_ref, o_ref):
    # x_ref: (ROWS_TILE, HW_TILE)  m_ref: (ROWS_TILE, 1)  o_ref: same as x_ref
    o_ref[...] = (x_ref[...] * m_ref[...]).astype(o_ref.dtype)


# ----------------------------- wrapper ---------------------------------------
def band_attention(x_nchw, w1, b1, w2, b2):
    """x_nchw: (B, C, H, W). w1: (C, Ch), b1: (Ch,), w2: (Ch, C), b2: (C,)."""
    B, C, H, W = x_nchw.shape
    BC = B * C
    HW = H * W
    Ch = w1.shape[1]
    dtype = x_nchw.dtype
    itemsize = jnp.dtype(dtype).itemsize

    # (B*C, HW) layout: sublane-dense rows, lane-dense (128-multiple) columns.
    BC_pad = _round_up(BC, 8)
    ROWS_TILE = _pick_tile(BC_pad, 8, 256)
    HW_pad = _round_up(HW, 128)
    HW_TILE = _pick_tile(HW_pad, 128, 2048)
    n_rows = BC_pad // ROWS_TILE
    n_hw = HW_pad // HW_TILE

    x2 = x_nchw.reshape(BC, HW)
    if BC_pad != BC or HW_pad != HW:
        x2 = jnp.pad(x2, ((0, BC_pad - BC), (0, HW_pad - HW)))

    vmem_limit = 32 * 1024 * 1024

    # ---- pass 1: per-row sum / max, pipelined over HW tiles -----------------
    reduce_cost = pl.CostEstimate(
        flops=2 * BC_pad * HW_pad,
        transcendentals=0,
        bytes_accessed=BC_pad * HW_pad * itemsize + 2 * BC_pad * 4,
    )
    sum_out, max_out = pl.pallas_call(
        functools.partial(_pool_reduce_kernel, hw_real=HW, hw_tile=HW_TILE,
                          mask_lanes=(HW_pad != HW)),
        out_shape=(jax.ShapeDtypeStruct((BC_pad, 1), jnp.float32),
                   jax.ShapeDtypeStruct((BC_pad, 1), jnp.float32)),
        grid=(n_rows, n_hw),
        in_specs=[pl.BlockSpec((ROWS_TILE, HW_TILE), lambda r, h: (r, h))],
        out_specs=(pl.BlockSpec((ROWS_TILE, 1), lambda r, h: (r, 0)),
                   pl.BlockSpec((ROWS_TILE, 1), lambda r, h: (r, 0))),
        compiler_params=pltpu.CompilerParams(
            dimension_semantics=("parallel", "arbitrary"),
            vmem_limit_bytes=vmem_limit),
        cost_estimate=reduce_cost,
    )(x2)

    pooled_sum = sum_out[:BC, 0].reshape(B, C)
    pooled_max = max_out[:BC, 0].reshape(B, C)

    # ---- tiny FC + sigmoid on the pooled (B, C) vectors ----------------------
    b1_2d = b1.reshape(1, Ch)
    b2_2d = b2.reshape(1, C)
    m = pl.pallas_call(
        functools.partial(_fc_mask_kernel, inv_hw=1.0 / HW),
        out_shape=jax.ShapeDtypeStruct((B, C), jnp.float32),
        grid=(1,),
        in_specs=[pl.BlockSpec((B, C), lambda i: (0, 0)),
                  pl.BlockSpec((B, C), lambda i: (0, 0)),
                  pl.BlockSpec((C, Ch), lambda i: (0, 0)),
                  pl.BlockSpec((1, Ch), lambda i: (0, 0)),
                  pl.BlockSpec((Ch, C), lambda i: (0, 0)),
                  pl.BlockSpec((1, C), lambda i: (0, 0))],
        out_specs=pl.BlockSpec((B, C), lambda i: (0, 0)),
        compiler_params=pltpu.CompilerParams(
            dimension_semantics=("arbitrary",)),
    )(pooled_sum, pooled_max, w1, b1_2d, w2, b2_2d)

    m_rows = m.reshape(BC, 1)
    if BC_pad != BC:
        m_rows = jnp.pad(m_rows, ((0, BC_pad - BC), (0, 0)))

    # ---- pass 2: stream x again and scale by per-row mask -------------------
    scale_cost = pl.CostEstimate(
        flops=BC_pad * HW_pad,
        transcendentals=0,
        bytes_accessed=2 * BC_pad * HW_pad * itemsize + BC_pad * 4,
    )
    out2 = pl.pallas_call(
        _scale_kernel,
        out_shape=jax.ShapeDtypeStruct((BC_pad, HW_pad), dtype),
        grid=(n_rows, n_hw),
        in_specs=[pl.BlockSpec((ROWS_TILE, HW_TILE), lambda r, h: (r, h)),
                  pl.BlockSpec((ROWS_TILE, 1), lambda r, h: (r, 0))],
        out_specs=pl.BlockSpec((ROWS_TILE, HW_TILE), lambda r, h: (r, h)),
        compiler_params=pltpu.CompilerParams(
            dimension_semantics=("parallel", "parallel"),
            vmem_limit_bytes=vmem_limit),
        cost_estimate=scale_cost,
    )(x2, m_rows)

    return out2[:BC, :HW].reshape(B, C, H, W)


def band_attention_ref(x_nchw, w1, b1, w2, b2):
    """Pure-JAX reference matching the PyTorch forward (eval mode)."""
    avg = jnp.mean(x_nchw, axis=(-2, -1))
    mx = jnp.max(x_nchw, axis=(-2, -1))

    def fcnet(y):
        h = jnp.tanh(y @ w1 + b1)
        return jnp.tanh(h @ w2 + b2)

    m = jax.nn.sigmoid(fcnet(avg) + fcnet(mx))
    return x_nchw * m[:, :, None, None]


if __name__ == "__main__":
    # Small shapes consistent with the module: NCHW input, reduction=2.
    B, C, H, W = 2, 4, 16, 16
    reduction = 2
    Ch = C // reduction

    key = jax.random.PRNGKey(0)
    kx, k1, kb1, k2, kb2 = jax.random.split(key, 5)

    x = jax.random.normal(kx, (B, C, H, W), dtype=jnp.float32)

    # PyTorch Linear default init: U(-1/sqrt(fan_in), +1/sqrt(fan_in)).
    # Stored transposed vs. PyTorch (in_features, out_features) so kernel does y @ W.
    lim1 = 1.0 / np.sqrt(C)
    lim2 = 1.0 / np.sqrt(Ch)
    w1 = jax.random.uniform(k1, (C, Ch), jnp.float32, -lim1, lim1)
    b1 = jax.random.uniform(kb1, (Ch,), jnp.float32, -lim1, lim1)
    w2 = jax.random.uniform(k2, (Ch, C), jnp.float32, -lim2, lim2)
    b2 = jax.random.uniform(kb2, (C,), jnp.float32, -lim2, lim2)

    # TODO(synk): nn.Dropout is stochastic in train mode; implemented as identity (eval-mode semantics).
    out = band_attention(x, w1, b1, w2, b2)
    out = jax.block_until_ready(out)

    ref = band_attention_ref(x, w1, b1, w2, b2)
    np.testing.assert_allclose(np.asarray(out), np.asarray(ref), rtol=1e-5, atol=1e-5)

    print("KERNEL_OK")
</pallas_src>

<mosaic_0001>
module attributes {stable_mosaic.version = 11 : i64} {
  func.func @_pool_reduce_kernel(%arg0: i32, %arg1: i32, %arg2: memref<8x256xf32, #tpu.memory_space<vmem>>, %arg3: memref<8x1xf32, #tpu.memory_space<vmem>>, %arg4: memref<8x1xf32, #tpu.memory_space<vmem>>) attributes {dimension_semantics = [#tpu.dimension_semantics<parallel>, #tpu.dimension_semantics<arbitrary>], iteration_bounds = array<i64: 1, 1>, scalar_prefetch = 0 : i64, scratch_operands = 0 : i64, tpu.core_type = #tpu.core_type<tc>, window_params = [{transform_indices = @transform_0, window_bounds = array<i64: 8, 256>}, {transform_indices = @transform_1, window_bounds = array<i64: 8, 1>}, {transform_indices = @transform_2, window_bounds = array<i64: 8, 1>}]} {
    %c0_i32 = arith.constant 0 : i32
    %0 = arith.cmpi eq, %arg1, %c0_i32 : i32
    %1 = arith.extui %0 : i1 to i32
    %c0_i32_0 = arith.constant 0 : i32
    %2 = arith.cmpi ne, %1, %c0_i32_0 : i32
    scf.if %2 {
      %cst_11 = arith.constant 0.000000e+00 : f32
      %14 = vector.broadcast %cst_11 : f32 to vector<8x1xf32>
      %c0_12 = arith.constant 0 : index
      %c0_13 = arith.constant 0 : index
      %15 = vector.load %arg3[%c0_12, %c0_13] : memref<8x1xf32, #tpu.memory_space<vmem>>, vector<8x1xf32>
      tpu.vector_store %arg3[%c0_12, %c0_13], %14 {strides = array<i32>} : memref<8x1xf32, #tpu.memory_space<vmem>>, vector<8x1xf32>,
      %cst_14 = arith.constant 0xFF800000 : f32
      %16 = vector.broadcast %cst_14 : f32 to vector<8x1xf32>
      %c0_15 = arith.constant 0 : index
      %c0_16 = arith.constant 0 : index
      %17 = vector.load %arg4[%c0_15, %c0_16] : memref<8x1xf32, #tpu.memory_space<vmem>>, vector<8x1xf32>
      tpu.vector_store %arg4[%c0_15, %c0_16], %16 {strides = array<i32>} : memref<8x1xf32, #tpu.memory_space<vmem>>, vector<8x1xf32>,
    } else {
    }
    %c0 = arith.constant 0 : index
    %c0_1 = arith.constant 0 : index
    %3 = vector.load %arg2[%c0, %c0_1] : memref<8x256xf32, #tpu.memory_space<vmem>>, vector<8x256xf32>
    %c0_2 = arith.constant 0 : index
    %c0_3 = arith.constant 0 : index
    %4 = vector.load %arg3[%c0_2, %c0_3] : memref<8x1xf32, #tpu.memory_space<vmem>>, vector<8x1xf32>
    %cst = arith.constant dense<0.000000e+00> : vector<8xf32>
    %5 = vector.multi_reduction <add>, %3, %cst [1] : vector<8x256xf32> to vector<8xf32>
    %6 = vector.shape_cast %5 : vector<8xf32> to vector<8x1xf32>
    %7 = arith.addf %4, %6 : vector<8x1xf32>
    %c0_4 = arith.constant 0 : index
    %c0_5 = arith.constant 0 : index
    %8 = vector.load %arg3[%c0_4, %c0_5] : memref<8x1xf32, #tpu.memory_space<vmem>>, vector<8x1xf32>
    tpu.vector_store %arg3[%c0_4, %c0_5], %7 {strides = array<i32>} : memref<8x1xf32, #tpu.memory_space<vmem>>, vector<8x1xf32>,
    %c0_6 = arith.constant 0 : index
    %c0_7 = arith.constant 0 : index
    %9 = vector.load %arg4[%c0_6, %c0_7] : memref<8x1xf32, #tpu.memory_space<vmem>>, vector<8x1xf32>
    %cst_8 = arith.constant dense<0xFF800000> : vector<8xf32>
    %10 = vector.multi_reduction <maximumf>, %3, %cst_8 [1] : vector<8x256xf32> to vector<8xf32>
    %11 = vector.shape_cast %10 : vector<8xf32> to vector<8x1xf32>
    %12 = arith.maximumf %9, %11 : vector<8x1xf32>
    %c0_9 = arith.constant 0 : index
    %c0_10 = arith.constant 0 : index
    %13 = vector.load %arg4[%c0_9, %c0_10] : memref<8x1xf32, #tpu.memory_space<vmem>>, vector<8x1xf32>
    tpu.vector_store %arg4[%c0_9, %c0_10], %12 {strides = array<i32>} : memref<8x1xf32, #tpu.memory_space<vmem>>, vector<8x1xf32>,
    return
  }
  func.func @transform_0(%arg0: i32, %arg1: i32) -> (i32, i32) {
    %c0_i32 = arith.constant 0 : i32
    return %arg0, %arg1 : i32, i32
  }
  func.func @transform_1(%arg0: i32, %arg1: i32) -> (i32, i32) {
    %c0_i32 = arith.constant 0 : i32
    %c0_i32_0 = arith.constant 0 : i32
    return %arg0, %c0_i32 : i32, i32
  }
  func.func @transform_2(%arg0: i32, %arg1: i32) -> (i32, i32) {
    %c0_i32 = arith.constant 0 : i32
    %c0_i32_0 = arith.constant 0 : i32
    return %arg0, %c0_i32 : i32, i32
  }
}

</mosaic_0001>

<bundles_post_ra>
// kernel: tpu_custom_call.1
= control target key start
LH: loop header
LB: loop body
LE: loop exit
PB: predicated region body
PF: predicated region fallthrough
CT: control target
= control target key end

     0   :  { %8 = vsyncpa [#allocation3], 0  ;;  %s80_s9 = smov [#allocation2]   ;;  %s132_s0 = inlined_call_operand.hbm [shape: f32[8,256], index: 0, kind: input, shape index: {}]   ;;  %s133_s1 = inlined_call_operand.vmem [shape: f32[8,1], index: 1, kind: output, shape index: {0}]   ;;  %s134_s2 = inlined_call_operand.vmem [shape: f32[8,1], index: 2, kind: output, shape index: {1}]  }
   0x1   :  { %s15_s10 = sshll.u32 %s80_s9, 4  ;;  %s56_s13 = scalar_lea.hbm %s132_s0, 256  ;;  %s16_s10 = int_to_ptr.vmem [resolvable:$true] %s15_s10 }
   0x2   :  { %p57_p0 = scmp.ne.s32.totalorder %s132_s0, %s56_s13  ;;  %p60_p1 = scmp.lt.u32.totalorder %s56_s13, %s132_s0 }
   0x4   :  { %p62_p2 = pnand %p60_p1, %p57_p0 }
   0x6   :  { %65 = shalt.err (!%p62_p2)
}
   0x7   :  { %s66_s18 = scalar_lea.vmem %s16_s10, 256  ;;  %p71_p4 = scmp.lt.s32.totalorder %s16_s10, %s16_s10 }
   0x8   :  { %p67_p3 = scmp.ne.s32.totalorder %s16_s10, %s66_s18  ;;  %p72_p5 = scmp.lt.s32.totalorder %s66_s18, %s66_s18 }
   0xa   :  { %p73_p6 = por %p72_p5, %p71_p4 }
   0xc   :  { %p74_p7 = pnand %p73_p6, %p67_p3 }
   0xe   :  { %77 = shalt.err (!%p74_p7)
}
   0xf   :  { %18 = dma.hbm_to_vmem [thread:$0]  %s132_s0, 256, %s16_s10, [#allocation3]  }
  0x10   :  { %78 = dma.done.wait [#allocation3], 256  }
  0x11   :  { %79 = vsyncadd [#allocation3], 4294967040  ;;  %vm26_vm0 = vcmask 7168   ;;  %v81_v0 = vmov 0.0   ;;  %v29_v1 = vld [vmem:[#allocation2] sm:$0xff]  ;;  %v30_v2 = vld [vmem:[#allocation2 + $0x8] sm:$0xff] }
  0x12   :  { %27 = vst.msk [vmem:[%s133_s1] sm:$0xff] %vm26_vm0, %v81_v0  ;;  %v32_v3 = vadd.f32 %v30_v2, %v29_v1  ;;  %v39_v4 = vmax.f32 %v29_v1, %v30_v2  ;;  %v82_v5 = vmov -inf  }
  0x13   :  { %28 = vst.msk [vmem:[%s134_s2] sm:$0xff] %vm26_vm0, %v82_v5 }
  0x14   :  { %33 = vadd.xlane.f32.xlu0 %v32_v3 }
  0x18   :  { %40 = vmax.xlane.f32.xlu0 %v39_v4 }
  0x19   :  { %v31_v6 = vld [vmem:[%s133_s1] sm:$0xff] }
  0x1a   :  { %v38_v9 = vld [vmem:[%s134_s2] sm:$0xff] }
  0xa1   :  { %v34_v7 = vpop.xlane.xlu0 %33 }
  0xa2   :  { %v35_v8 = vadd.f32 %v34_v7, %v31_v6 }
  0xa4   :  { %37 = vst.msk [vmem:[%s133_s1] sm:$0xff] %vm26_vm0, %v35_v8 }
  0xa5   :  { %v41_v10 = vpop.xlane.xlu0 %40 }
  0xa6   :  { %v42_v11 = vmax.f32 %v38_v9, %v41_v10 }
  0xa8   :  { %43 = vst.msk [vmem:[%s134_s2] sm:$0xff] %vm26_vm0, %v42_v11 }
  0xa9   :  { %52 = vsyncpa [#allocation3], 1 }

</bundles_post_ra>
